<compile_context>
chip_gen: v6e
topology: v6e:2x2x1
jax: 0.10.0
libtpu: 0.0.40
codegen_flags: <defaults>
</compile_context>

<pallas_src>
import jax
import jax.numpy as jnp
from jax.experimental import pallas as pl
from jax.experimental.pallas import tpu as pltpu


def _glu_kernel(out_ref, gate_ref, o_ref):
    # Tiles are (1, TR, LANE), lane-dense in LANE.  Upcast once, compute in
    # f32, downcast once at the store.
    a = out_ref[...].astype(jnp.float32)
    g = gate_ref[...].astype(jnp.float32)
    o_ref[...] = (a * jax.nn.sigmoid(g)).astype(o_ref.dtype)


def _choose_lane_layout(c_half, h, w):
    """Factor c_half*h*w = rows * lane with lane a multiple of 128 when
    possible, so stores are unmasked and full-width."""
    flat = c_half * h * w
    for lane in (1024, 512, 256, 128):
        if flat % lane == 0:
            return flat // lane, lane
    # Fallback: spatial dims stay on the lane axis; full-extent last dim is
    # always a legal block (stores may be masked if h*w % 128 != 0).
    return c_half, h * w


def _pick_row_tile(n, rows, lane, itemsize, target_bytes=4 << 20):
    """Row tile that (a) is a multiple of the sublane count or the full row
    extent, (b) keeps one block under ~target_bytes, and (c) leaves >=2 grid
    steps for megacore sharding (v7x has 2 TensorCores) when possible."""
    sublane = 8 * max(1, 4 // itemsize)  # 8 for f32, 16 for bf16, 32 for int8
    if rows <= sublane:
        return rows
    budget_rows = max(
        sublane, (target_bytes // (lane * itemsize)) // sublane * sublane
    )
    tr = min(rows, budget_rows)
    if n * pl.cdiv(rows, tr) < 2:
        # Grid would be a single step: split rows so both TCs get work.
        tr = max(sublane, ((rows // 2) // sublane) * sublane)
    return tr


def glu(x):
    """GLU along dim=1 of an NCHW tensor (out * sigmoid(gate)) via Pallas."""
    n, c, h, w = x.shape
    assert c % 2 == 0, "GLU requires an even number of channels along dim=1"
    c_half = c // 2
    itemsize = jnp.dtype(x.dtype).itemsize

    rows, lane = _choose_lane_layout(c_half, h, w)
    tr = _pick_row_tile(n, rows, lane, itemsize)
    n_rblocks = pl.cdiv(rows, tr)

    # Pure contiguous view: split channels into halves, merge each half with
    # the spatial dims, then factor into (rows, lane).
    x4 = x.reshape(n, 2, rows, lane)

    elems = n * c_half * h * w
    out3 = pl.pallas_call(
        _glu_kernel,
        out_shape=jax.ShapeDtypeStruct((n, rows, lane), x.dtype),
        grid=(n, n_rblocks),
        in_specs=[
            # "out" half: half-axis block 0 (squeezed out of the kernel ref).
            pl.BlockSpec((1, None, tr, lane), lambda i, j: (i, 0, j, 0)),
            # "gate" half: half-axis block 1.
            pl.BlockSpec((1, None, tr, lane), lambda i, j: (i, 1, j, 0)),
        ],
        out_specs=pl.BlockSpec((1, tr, lane), lambda i, j: (i, j, 0)),
        compiler_params=pltpu.CompilerParams(
            dimension_semantics=("parallel", "parallel"),
            vmem_limit_bytes=48 * 1024 * 1024,
        ),
        cost_estimate=pl.CostEstimate(
            flops=elems,
            transcendentals=elems,
            bytes_accessed=3 * elems * itemsize,
        ),
    )(x4, x4)

    return out3.reshape(n, c_half, h, w)


def _glu_ref(x):
    out_half, gate_half = jnp.split(x, 2, axis=1)
    return out_half * jax.nn.sigmoid(gate_half)


if __name__ == "__main__":
    key = jax.random.PRNGKey(0)

    # Primary case: batch=2, channels=8 (split -> 4), spatial 16x16.
    # flat = 4*16*16 = 1024 -> lane-dense (rows=1, lane=1024) layout.
    x = jax.random.normal(key, (2, 8, 16, 16), dtype=jnp.float32)
    y = glu(x)
    jax.block_until_ready(y)
    assert y.shape == (2, 4, 16, 16), y.shape
    assert jnp.allclose(y, _glu_ref(x), atol=1e-5, rtol=1e-5), "mismatch (main)"

    # Robustness case: flat = 3*7*7 = 147, not a multiple of 128 -> fallback
    # layout with full-extent blocks.
    x2 = jax.random.normal(jax.random.PRNGKey(1), (2, 6, 7, 7), dtype=jnp.float32)
    y2 = glu(x2)
    jax.block_until_ready(y2)
    assert y2.shape == (2, 3, 7, 7), y2.shape
    assert jnp.allclose(y2, _glu_ref(x2), atol=1e-5, rtol=1e-5), "mismatch (odd)"

    print("KERNEL_OK")
</pallas_src>

<mosaic_0001>
module attributes {stable_mosaic.version = 11 : i64} {
  func.func @_glu_kernel(%arg0: i32, %arg1: i32, %arg2: memref<1x1x1x1024xf32, #tpu.memory_space<vmem>>, %arg3: memref<1x1x1x1024xf32, #tpu.memory_space<vmem>>, %arg4: memref<1x1x1024xf32, #tpu.memory_space<vmem>>) attributes {dimension_semantics = [#tpu.dimension_semantics<parallel>, #tpu.dimension_semantics<parallel>], iteration_bounds = array<i64: 2, 1>, scalar_prefetch = 0 : i64, scratch_operands = 0 : i64, tpu.core_type = #tpu.core_type<tc>, window_params = [{transform_indices = @transform_0, window_bounds = array<i64: 1, 1, 1, 1024>}, {transform_indices = @transform_1, window_bounds = array<i64: 1, 1, 1, 1024>}, {transform_indices = @transform_2, window_bounds = array<i64: 1, 1, 1024>}]} {
    %c0 = arith.constant 0 : index
    %c0_0 = arith.constant 0 : index
    %c0_1 = arith.constant 0 : index
    %c0_2 = arith.constant 0 : index
    %0 = vector.load %arg2[%c0, %c0_0, %c0_1, %c0_2] : memref<1x1x1x1024xf32, #tpu.memory_space<vmem>>, vector<1x1x1x1024xf32>
    %1 = vector.shape_cast %0 : vector<1x1x1x1024xf32> to vector<1x1x1024xf32>
    %c0_3 = arith.constant 0 : index
    %c0_4 = arith.constant 0 : index
    %c0_5 = arith.constant 0 : index
    %c0_6 = arith.constant 0 : index
    %2 = vector.load %arg3[%c0_3, %c0_4, %c0_5, %c0_6] : memref<1x1x1x1024xf32, #tpu.memory_space<vmem>>, vector<1x1x1x1024xf32>
    %3 = vector.shape_cast %2 : vector<1x1x1x1024xf32> to vector<1x1x1024xf32>
    %4 = arith.negf %3 : vector<1x1x1024xf32>
    %5 = math.exp %4 : vector<1x1x1024xf32>
    %cst = arith.constant 1.000000e+00 : f32
    %6 = vector.broadcast %cst : f32 to vector<1x1x1024xf32>
    %7 = arith.addf %6, %5 : vector<1x1x1024xf32>
    %8 = arith.divf %6, %7 : vector<1x1x1024xf32>
    %9 = arith.mulf %1, %8 : vector<1x1x1024xf32>
    %c0_7 = arith.constant 0 : index
    %c0_8 = arith.constant 0 : index
    %c0_9 = arith.constant 0 : index
    %10 = vector.load %arg4[%c0_7, %c0_8, %c0_9] : memref<1x1x1024xf32, #tpu.memory_space<vmem>>, vector<1x1x1024xf32>
    tpu.vector_store %arg4[%c0_7, %c0_8, %c0_9], %9 {strides = array<i32>} : memref<1x1x1024xf32, #tpu.memory_space<vmem>>, vector<1x1x1024xf32>,
    return
  }
  func.func @transform_0(%arg0: i32, %arg1: i32) -> (i32, i32, i32, i32) {
    %c0_i32 = arith.constant 0 : i32
    %c0_i32_0 = arith.constant 0 : i32
    %c0_i32_1 = arith.constant 0 : i32
    return %arg0, %c0_i32, %arg1, %c0_i32_0 : i32, i32, i32, i32
  }
  func.func @transform_1(%arg0: i32, %arg1: i32) -> (i32, i32, i32, i32) {
    %c1_i32 = arith.constant 1 : i32
    %c0_i32 = arith.constant 0 : i32
    %c0_i32_0 = arith.constant 0 : i32
    return %arg0, %c1_i32, %arg1, %c0_i32 : i32, i32, i32, i32
  }
  func.func @transform_2(%arg0: i32, %arg1: i32) -> (i32, i32, i32) {
    %c0_i32 = arith.constant 0 : i32
    %c0_i32_0 = arith.constant 0 : i32
    return %arg0, %arg1, %c0_i32 : i32, i32, i32
  }
}

</mosaic_0001>

<bundles_post_ra>
// kernel: tpu_custom_call.1
= control target key start
LH: loop header
LB: loop body
LE: loop exit
PB: predicated region body
PF: predicated region fallthrough
CT: control target
= control target key end

     0   :  { %7 = vsyncpa [#allocation3], 0  ;;  %s775_s0 = inlined_call_operand.hbm [shape: f32[2,2,1,1024], index: 0, kind: input, shape index: {}]   ;;  %s776_s1 = inlined_call_operand.hbm [shape: f32[2,2,1,1024], index: 1, kind: input, shape index: {}]   ;;  %s777_s2 = inlined_call_operand.hbm [shape: f32[2,1,1024], index: 2, kind: output, shape index: {}]  }
   0x1   :  { %9 = vsyncpa [#allocation3 + $0x1], 0 }
   0x2   :  { %10 = vsyncpa [#allocation6], 0 }
   0x3   :  { %12 = vsyncpa [#allocation6 + $0x1], 0 }
   0x4   :  { %13 = vsyncpa [#allocation4], 0 }
   0x5   :  { %15 = vsyncpa [#allocation4 + $0x1], 0  ;;  %s614_s9 = smov 0   ;;  %s616_s10 = smov 0  }
   0x6   :  { %s618_s11 = smov 0   ;;  %s620_s12 = smov 0  }
   0x7   :  { %s622_s13 = smov 0   ;;  %s624_s14 = smov 0  }
   0x8 LB: > { %s359_s15 = sadd.s32 4294967295, %s594_s14   ;;  %s360_s16 = sadd.s32 4294967294, %s594_s14   ;;  %s594_s14 = sphi %s624_s14, %s21_s14   ;;  %s590_s13 = sphi %s622_s13, %s789_s13   ;;  %s586_s12 = sphi %s620_s12, %s788_s12   ;;  %s582_s11 = sphi %s618_s11, %s787_s11   ;;  %s578_s10 = sphi %s616_s10, %s786_s10   ;;  %s574_s9 = sphi %s614_s9, %s785_s9  }
   0x9   : > { %s33_s17 = sadd.s32 1, %s590_s13  ;;  %s42_s18 = sadd.s32 1, %s582_s11 }
   0xa   : > { %p35_p0 = scmp.ge.s32.totalorder %s33_s17, 2  ;;  %p49_p1 = scmp.ne.s32.totalorder %s582_s11, %s578_s10 }
   0xb   : > { %p50_p2 = scmp.eq.s32.totalorder %s594_s14, 0  ;;  %p55_p3 = scmp.ne.s32.totalorder %s578_s10, %s574_s9 }
   0xc   : > { %s791_s17 = smov (%p35_p0, %s33_s17), 0  ;;  %p56_p5 = scmp.eq.s32.totalorder %s359_s15, 0 }
   0xd   : > { %p655_p4 = por %p50_p2, %p49_p1  ;;  %s37_s20 = ssub.s32 %s590_s13, %s791_s17 }
   0xe   : > { %p109_p6 = scmp.eq.s32.totalorder %s359_s15, 1  ;;  %p40_p7 = scmp.eq.s32.totalorder %s37_s20, 0 }
   0xf   : > { %p661_p8 = por %p56_p5, %p55_p3  ;;  %p115_p10 = scmp.eq.s32.totalorder %s360_s16, 1 }
  0x10   : > { %p665_p9 = por %p109_p6, %p49_p1  ;;  %p399_p13 = scmp.lt.s32.totalorder %s594_s14, 2 }
  0x11   : > { %s670_s23 = scalar_select %p40_p7, %s582_s11, %s42_s18  }
  0x12   : > { %p672_p11 = por %p115_p10, %p55_p3  ;;  %s679_s25 = sand.u32 1, %s582_s11  }
  0x13   : > { %s363_s26 = sshll.u32 %s679_s25, 3  ;;  %s379_s27 = sshll.u32 %s590_s13, 8 }
  0x14   : > { %s147_s30 = scalar_lea.hbm %s775_s0, %s379_s27  ;;  %s139_s3 = scalar_lea.vmem [#allocation2], %s363_s26 }
  0x15   : > { %s149_s4 = sshll.u32 %s139_s3, 4  ;;  %p688_p0 = pnand %p399_p13, %p655_p4  ;;  %s150_s4 = int_to_ptr.vmem [resolvable:$true] %s149_s4 }
  0x16   : > { %p369_p1 = scmp.ge.s32.totalorder %s594_s14, 1  ;;  %p176_p2 = scmp.lt.s32.totalorder %s594_s14, 3 }
  0x17   : > { %s136_s6 = scalar_lea.sflag [#allocation3], %s679_s25  ;;  %p455_p3 = pneg %p688_p0 }
  0x18   : > { %s466_s7 = scalar_lea.vmem %s150_s4, 128  ;;  %s596_s8 = smov [#allocation2]  }
  0x19   : > { %p467_p5 = scmp.ne.s32.totalorder %s150_s4, %s466_s7  ;;  %s471_s15 = sshll.u32 %s596_s8, 4  ;;  %s472_s15 = int_to_ptr.vmem [resolvable:$false] %s471_s15 }
  0x1a   : > { %s473_s16 = scalar_lea.vmem %s472_s15, 256  ;;  %p474_p4 = scmp.lt.s32.totalorder %s150_s4, %s472_s15 }
  0x1b   : > { %p469_p6 = pnand %p467_p5, %p455_p3  ;;  %p475_p10 = scmp.lt.s32.totalorder %s473_s16, %s466_s7 }
  0x1d   : > { %p470_p7 = pneg %p469_p6  ;;  %p476_p13 = por %p475_p10, %p474_p4 }
  0x1f   : > { %p477_p12 = pnand %p476_p13, %p470_p7 }
  0x21   : > { %480 = shalt.err (!%p477_p12)
}
  0x22   : > { %391 = dma.hbm_to_vmem [thread:$0]  (!%p688_p0), %s147_s30, 128, %s150_s4, %s136_s6  }
  0x23   : > { %p706_p5 = pnand %p369_p1, %p176_p2  ;;  %s290_s28 = scalar_lea.hbm %s776_s1, %s379_s27 }
  0x24   : > { %s160_s29 = scalar_lea.vmem [#allocation5], %s363_s26  ;;  %s291_s7 = scalar_lea.hbm %s290_s28, 128 }
  0x25   : > { %s171_s3 = sshll.u32 %s160_s29, 4  ;;  %s157_s8 = scalar_lea.sflag [#allocation6], %s679_s25  ;;  %s172_s3 = int_to_ptr.vmem [resolvable:$true] %s171_s3 }
  0x26   : > { %s494_s15 = scalar_lea.vmem %s172_s3, 128  ;;  %s597_s30 = smov [#allocation5]  }
  0x27   : > { %p495_p12 = scmp.ne.s32.totalorder %s172_s3, %s494_s15  ;;  %s499_s4 = sshll.u32 %s597_s30, 4  ;;  %s500_s4 = int_to_ptr.vmem [resolvable:$false] %s499_s4 }
  0x28   : > { %s501_s6 = scalar_lea.vmem %s500_s4, 256  ;;  %p502_p1 = scmp.lt.s32.totalorder %s172_s3, %s500_s4 }
  0x29   : > { %p497_p6 = pnand %p495_p12, %p455_p3  ;;  %p503_p2 = scmp.lt.s32.totalorder %s501_s6, %s494_s15 }
  0x2b   : > { %p498_p7 = pneg %p497_p6  ;;  %p504_p4 = por %p503_p2, %p502_p1 }
  0x2d   : > { %p505_p10 = pnand %p504_p4, %p498_p7 }
  0x2f   : > { %508 = shalt.err (!%p505_p10)
}
  0x30   : > { %394 = dma.hbm_to_vmem [thread:$0]  (!%p688_p0), %s291_s7, 128, %s172_s3, %s157_s8  }
  0x31   : > { %180 = sbr.rel (%p706_p5) target bundleno = 105 (0x69), region = 28  ;;  %s722_s25 = sand.u32 (!%p706_p5), 1, %s578_s10  }
  0x32   : > { %s370_s26 = sshll.u32 (!%p706_p5), %s722_s25, 3  ;;  %s183_s27 = scalar_lea.sflag (!%p706_p5), [#allocation3], %s722_s25 }
  0x33   : > { %s186_s16 = scalar_lea.vmem (!%p706_p5), [#allocation2], %s370_s26 }
  0x36   : > { %561 = dma.done.wait (%p661_p8), %s183_s27, 128  }
  0x37   : > { %563 = vsyncadd (%p661_p8), %s183_s27, 4294967168  ;;  %s192_s5 = scalar_lea.sflag [#allocation6], %s722_s25  ;;  %s195_s19 = scalar_lea.vmem [#allocation5], %s370_s26 }
  0x38   : > { %565 = dma.done.wait (%p661_p8), %s192_s5, 128  }
  0x39   : > { %567 = vsyncadd (%p661_p8), %s192_s5, 4294967168  ;;  %v222_v0 = vld [vmem:[%s195_s19] sm:$0xff]  ;;  %v221_v4 = vld [vmem:[%s186_s16] sm:$0xff]  ;;  %s220_s18 = scalar_lea.vmem [#allocation7], %s370_s26  ;;  %s381_s28 = sshll.u32 %s586_s12, 7 }
  0x3a   : > { %v373_v1 = vmul.f32 -1.442695, %v222_v0  ;;  %s248_s20 = sshll.u32 %s220_s18, 4  ;;  %s246_s21 = scalar_lea.hbm %s777_s2, %s381_s28  ;;  %s249_s20 = int_to_ptr.vmem [resolvable:$true] %s248_s20 }
  0x3b   : > { %s232_s7 = scalar_lea.sflag [#allocation4], %s722_s25  ;;  %s510_s8 = scalar_lea.vmem %s249_s20, 128 }
  0x3c   : > { %449 = vpow2.f32 %v373_v1  ;;  %p511_p8 = scmp.ne.s32.totalorder %s249_s20, %s510_s8  ;;  %s598_s15 = smov [#allocation7]  }
  0x3d   : > { %s514_s30 = sshll.u32 %s598_s15, 4  ;;  %s515_s30 = int_to_ptr.vmem [resolvable:$false] %s514_s30 }
  0x3e   : > { %p512_p0 = pnand %p511_p8, %p665_p9  ;;  %s516_s4 = scalar_lea.vmem %s515_s30, 256 }
  0x3f   : > { %p517_p13 = scmp.lt.s32.totalorder %s249_s20, %s515_s30  ;;  %p518_p5 = scmp.lt.s32.totalorder %s516_s4, %s510_s8 }
  0x40   : > { %p513_p3 = pneg %p512_p0 }
  0x41   : > { %p519_p12 = por %p518_p5, %p517_p13 }
  0x43   : > { %p520_p6 = pnand %p519_p12, %p513_p3 }
  0x49   : > { %v450_v2 = vpop.eup %449 }
  0x4a   : > { %v226_v3 = vadd.f32 1.0, %v450_v2 }
  0x4c   : > { %451 = vrcp.f32 %v226_v3 }
  0x59   : > { %v452_v5 = vpop.eup %451 }
  0x5a   : > { %v229_v6 = vmul.f32 %v452_v5, %v221_v4 }
  0x5c   : > { %230 = vst [vmem:[%s220_s18] sm:$0xff] %v229_v6 }
  0x5d   : > { %523 = shalt.err (!%p520_p6)
}
  0x5e   : > { %s524_s12 = scalar_lea.hbm %s246_s21, 128  ;;  %s528_s26 = scalar_lea.hbm %s777_s2, 256 }
  0x5f   : > { %p525_p7 = scmp.ne.s32.totalorder %s246_s21, %s524_s12  ;;  %p529_p4 = scmp.lt.s32.totalorder %s246_s21, %s777_s2 }
  0x60   : > { %p530_p10 = scmp.lt.s32.totalorder %s528_s26, %s524_s12 }
  0x61   : > { %p526_p1 = pnand %p525_p7, %p665_p9 }
  0x62   : > { %p531_p8 = por %p530_p10, %p529_p4 }
  0x63   : > { %p527_p2 = pneg %p526_p1 }
  0x65   : > { %p532_p0 = pnand %p531_p8, %p527_p2 }
  0x67   : > { %535 = shalt.err (!%p532_p0)
}
  0x68   : > { %386 = dma.vmem_to_hbm [thread:$0]  (%p665_p9), %s249_s20, 128, %s246_s21, %s232_s7  }
  0x69 PF: > { %s260_s5 = sand.u32 1, %s574_s9   ;;  %p784_p3 = scmp.ge.s32.totalorder %s594_s14, 2 }
  0x6a   : > { %s261_s19 = scalar_lea.sflag [#allocation4], %s260_s5 }
  0x6b   : > { %p396_p13 = pnand %p784_p3, %p672_p11 }
  0x6d   : > { %p397_p5 = pneg %p396_p13 }
  0x6f   : > { %569 = dma.done.wait (%p397_p5), %s261_s19, 128  }
  0x70   : > { %571 = vsyncadd (%p397_p5), %s261_s19, 4294967168  ;;  %s21_s14 = sadd.s32 1, %s594_s14   ;;  %s785_s9 = smov %s578_s10 }
  0x71   : > { %p18_p12 = scmp.ge.s32.totalorder %s21_s14, 4   ;;  %s786_s10 = smov %s582_s11 }
  0x72   : > { %s787_s11 = smov %s670_s23  ;;  %s788_s12 = smov %s590_s13 }
  0x73   : > { %s789_s13 = smov %s791_s17  ;;  %20 = sbr.rel (!%p18_p12) target bundleno = 8 (0x8), region = 86 }
  0x78   :  { %266 = vsyncpa [#allocation3], 1 }
  0x79   :  { %268 = vsyncpa [#allocation3 + $0x1], 1 }
  0x7a   :  { %269 = vsyncpa [#allocation6], 1 }
  0x7b   :  { %271 = vsyncpa [#allocation6 + $0x1], 1 }
  0x7c   :  { %272 = vsyncpa [#allocation4], 1 }
  0x7d   :  { %274 = vsyncpa [#allocation4 + $0x1], 1 }

</bundles_post_ra>
